<compile_context>
chip_gen: v6e
topology: v6e:2x2x1
jax: 0.10.0
libtpu: 0.0.40
codegen_flags: <defaults>
</compile_context>

<pallas_src>
import jax
import jax.numpy as jnp
from jax.experimental import pallas as pl
from jax.experimental.pallas import tpu as pltpu

_INV_12_92 = 1.0 / 12.92
_INV_1_055 = 1.0 / 1.055


def _grayscale_kernel(x_ref, o_ref):
    # x_ref: (3, TS, L) RGB block in VMEM; o_ref: (num_out, TS, L) output block.
    r = x_ref[0].astype(jnp.float32)
    g = x_ref[1].astype(jnp.float32)
    b = x_ref[2].astype(jnp.float32)

    # Luminance perception correction -> (TS, L)
    y = 0.2126 * r + 0.7152 * g + 0.0722 * b

    # Gamma expansion (inverse gamma compression), elementwise select.
    # jnp.where evaluates both branches, so guard the pow argument to keep the
    # "dead" branch (and garbage in boundary-block padding) finite.
    lin = y * _INV_12_92
    base = jnp.maximum((y + 0.055) * _INV_1_055, 1e-12)
    pow_branch = jnp.exp(2.4 * jnp.log(base))
    gamma = jnp.where(y <= 0.04045, lin, pow_branch)

    # Expand channels: same plane repeated num_output_channels times.
    num_out = o_ref.shape[0]
    o_ref[...] = jnp.broadcast_to(gamma[None], (num_out,) + gamma.shape).astype(o_ref.dtype)


def grayscale(x, num_output_channels=1, *, max_block_pixels=512 * 1024):
    """x: (3, H, W) array -> (num_output_channels, H, W)."""
    assert x.ndim == 3 and x.shape[0] == 3, "expected (3, H, W) RGB input"
    C, H, W = x.shape
    n = H * W

    # Lane width: largest candidate that divides n avoids any host-side
    # padding (the reshape below is then a pure metadata/bitcast op).
    for cand in (1024, 512, 256, 128):
        if n % cand == 0:
            lane = cand
            break
    else:
        lane = 512
    pad = (-n) % lane
    n_pad = n + pad

    if pad:
        # Pad only to one lane width (not a full tile); zeros go through the
        # linear branch -> 0 and are sliced off after the kernel.
        xf = jnp.pad(x.reshape(C, n), ((0, 0), (0, pad)))
    else:
        xf = x.reshape(C, n)

    rows = n_pad // lane
    xr = xf.reshape(C, rows, lane)

    if rows <= 8:
        ts = rows  # single full-extent block along the row axis
    else:
        # Cap the per-step block at ~max_block_pixels pixels (VMEM footprint,
        # v7x-safe), and shrink further so there are >= ~8 grid blocks for
        # megacore load balancing; ts stays a multiple of 8 (sublane-dense).
        ts_cap = max(8, (max_block_pixels // lane) // 8 * 8)
        ts_bal = max(8, (rows // 8) // 8 * 8)
        ts = min(ts_cap, ts_bal)

    grid = (pl.cdiv(rows, ts),)

    out = pl.pallas_call(
        _grayscale_kernel,
        out_shape=jax.ShapeDtypeStruct((num_output_channels, rows, lane), x.dtype),
        grid=grid,
        in_specs=[pl.BlockSpec((C, ts, lane), lambda i: (0, i, 0))],
        out_specs=pl.BlockSpec((num_output_channels, ts, lane), lambda i: (0, i, 0)),
        compiler_params=pltpu.CompilerParams(
            dimension_semantics=("parallel",),
            vmem_limit_bytes=48 * 1024 * 1024,
        ),
    )(xr)

    if pad:
        out = out.reshape(num_output_channels, n_pad)[:, :n]
    return out.reshape(num_output_channels, H, W)


def _reference(x, num_output_channels=1):
    y = 0.2126 * x[0] + 0.7152 * x[1] + 0.0722 * x[2]
    y = jnp.where(y <= 0.04045, y / 12.92, ((y + 0.055) / 1.055) ** 2.4)
    return jnp.stack((y,) * num_output_channels, axis=0)


if __name__ == "__main__":
    key = jax.random.PRNGKey(0)
    H, W = 16, 16
    # RGB image in [0, 1], channel-first like PyTorch
    x = jax.random.uniform(key, (3, H, W), dtype=jnp.float32)

    out = jax.block_until_ready(grayscale(x, num_output_channels=1))
    ref = _reference(x, num_output_channels=1)
    assert out.shape == ref.shape == (1, H, W)
    assert jnp.allclose(out, ref, atol=1e-5, rtol=1e-5)

    # Ragged size + multi-channel output: exercises the pad path and the
    # channel-expansion broadcast.
    x2 = jax.random.uniform(jax.random.PRNGKey(1), (3, 17, 19), dtype=jnp.float32)
    out2 = jax.block_until_ready(grayscale(x2, num_output_channels=3))
    ref2 = _reference(x2, num_output_channels=3)
    assert out2.shape == ref2.shape == (3, 17, 19)
    assert jnp.allclose(out2, ref2, atol=1e-5, rtol=1e-5)

    print("KERNEL_OK")
</pallas_src>

<mosaic_0001>
module attributes {stable_mosaic.version = 11 : i64} {
  func.func @_grayscale_kernel(%arg0: i32, %arg1: memref<3x1x256xf32, #tpu.memory_space<vmem>>, %arg2: memref<1x1x256xf32, #tpu.memory_space<vmem>>) attributes {dimension_semantics = [#tpu.dimension_semantics<parallel>], iteration_bounds = array<i64: 1>, scalar_prefetch = 0 : i64, scratch_operands = 0 : i64, tpu.core_type = #tpu.core_type<tc>, window_params = [{transform_indices = @transform_0, window_bounds = array<i64: 3, 1, 256>}, {transform_indices = @transform_1, window_bounds = array<i64: 1, 1, 256>}]} {
    %c0 = arith.constant 0 : index
    %c0_0 = arith.constant 0 : index
    %c0_1 = arith.constant 0 : index
    %0 = vector.load %arg1[%c0, %c0_0, %c0_1] : memref<3x1x256xf32, #tpu.memory_space<vmem>>, vector<1x1x256xf32>
    %1 = vector.shape_cast %0 : vector<1x1x256xf32> to vector<1x256xf32>
    %c1 = arith.constant 1 : index
    %c0_2 = arith.constant 0 : index
    %c0_3 = arith.constant 0 : index
    %2 = vector.load %arg1[%c1, %c0_2, %c0_3] : memref<3x1x256xf32, #tpu.memory_space<vmem>>, vector<1x1x256xf32>
    %3 = vector.shape_cast %2 : vector<1x1x256xf32> to vector<1x256xf32>
    %c2 = arith.constant 2 : index
    %c0_4 = arith.constant 0 : index
    %c0_5 = arith.constant 0 : index
    %4 = vector.load %arg1[%c2, %c0_4, %c0_5] : memref<3x1x256xf32, #tpu.memory_space<vmem>>, vector<1x1x256xf32>
    %5 = vector.shape_cast %4 : vector<1x1x256xf32> to vector<1x256xf32>
    %cst = arith.constant 2.126000e-01 : f32
    %6 = vector.broadcast %cst : f32 to vector<1x256xf32>
    %7 = arith.mulf %6, %1 : vector<1x256xf32>
    %cst_6 = arith.constant 7.152000e-01 : f32
    %8 = vector.broadcast %cst_6 : f32 to vector<1x256xf32>
    %9 = arith.mulf %8, %3 : vector<1x256xf32>
    %10 = arith.addf %7, %9 : vector<1x256xf32>
    %cst_7 = arith.constant 7.220000e-02 : f32
    %11 = vector.broadcast %cst_7 : f32 to vector<1x256xf32>
    %12 = arith.mulf %11, %5 : vector<1x256xf32>
    %13 = arith.addf %10, %12 : vector<1x256xf32>
    %cst_8 = arith.constant 0.0773993805 : f32
    %14 = vector.broadcast %cst_8 : f32 to vector<1x256xf32>
    %15 = arith.mulf %13, %14 : vector<1x256xf32>
    %cst_9 = arith.constant 5.500000e-02 : f32
    %16 = vector.broadcast %cst_9 : f32 to vector<1x256xf32>
    %17 = arith.addf %13, %16 : vector<1x256xf32>
    %cst_10 = arith.constant 0.947867274 : f32
    %18 = vector.broadcast %cst_10 : f32 to vector<1x256xf32>
    %19 = arith.mulf %17, %18 : vector<1x256xf32>
    %cst_11 = arith.constant 9.99999996E-13 : f32
    %20 = vector.broadcast %cst_11 : f32 to vector<1x256xf32>
    %21 = arith.maximumf %19, %20 : vector<1x256xf32>
    %22 = math.log %21 : vector<1x256xf32>
    %cst_12 = arith.constant 2.400000e+00 : f32
    %23 = vector.broadcast %cst_12 : f32 to vector<1x256xf32>
    %24 = arith.mulf %23, %22 : vector<1x256xf32>
    %25 = math.exp %24 : vector<1x256xf32>
    %cst_13 = arith.constant 4.045000e-02 : f32
    %26 = vector.broadcast %cst_13 : f32 to vector<1x256xf32>
    %27 = arith.cmpf ole, %13, %26 : vector<1x256xf32>
    %28 = arith.select %27, %15, %25 : vector<1x256xi1>, vector<1x256xf32>
    %29 = vector.shape_cast %28 : vector<1x256xf32> to vector<1x1x256xf32>
    %c0_14 = arith.constant 0 : index
    %c0_15 = arith.constant 0 : index
    %c0_16 = arith.constant 0 : index
    %30 = vector.load %arg2[%c0_14, %c0_15, %c0_16] : memref<1x1x256xf32, #tpu.memory_space<vmem>>, vector<1x1x256xf32>
    tpu.vector_store %arg2[%c0_14, %c0_15, %c0_16], %29 {strides = array<i32>} : memref<1x1x256xf32, #tpu.memory_space<vmem>>, vector<1x1x256xf32>,
    return
  }
  func.func @transform_0(%arg0: i32) -> (i32, i32, i32) {
    %c0_i32 = arith.constant 0 : i32
    %c0_i32_0 = arith.constant 0 : i32
    %c0_i32_1 = arith.constant 0 : i32
    return %c0_i32, %arg0, %c0_i32_0 : i32, i32, i32
  }
  func.func @transform_1(%arg0: i32) -> (i32, i32, i32) {
    %c0_i32 = arith.constant 0 : i32
    %c0_i32_0 = arith.constant 0 : i32
    %c0_i32_1 = arith.constant 0 : i32
    return %c0_i32, %arg0, %c0_i32_0 : i32, i32, i32
  }
}

</mosaic_0001>

<bundles_post_ra>
// kernel: tpu_custom_call.1
= control target key start
LH: loop header
LB: loop body
LE: loop exit
PB: predicated region body
PF: predicated region fallthrough
CT: control target
= control target key end

     0   :  { %6 = vsyncpa [#allocation3], 0  ;;  %s136_s0 = inlined_call_operand.hbm [shape: f32[3,1,256], index: 0, kind: input, shape index: {}]   ;;  %s137_s1 = inlined_call_operand.hbm [shape: f32[1,1,256], index: 1, kind: output, shape index: {}]  }
   0x1   :  { %7 = vsyncpa [#allocation4], 0  ;;  %s116_s6 = smov [#allocation2]  }
   0x2   :  { %s13_s7 = sshll.u32 %s116_s6, 4  ;;  %s14_s7 = int_to_ptr.vmem [resolvable:$true] %s13_s7 }
   0x3   :  { %s80_s8 = scalar_lea.vmem %s14_s7, 96  ;;  %p85_p1 = scmp.lt.s32.totalorder %s14_s7, %s14_s7 }
   0x4   :  { %p81_p0 = scmp.ne.s32.totalorder %s14_s7, %s80_s8  ;;  %p86_p2 = scmp.lt.s32.totalorder %s80_s8, %s80_s8 }
   0x6   :  { %p87_p3 = por %p86_p2, %p85_p1 }
   0x8   :  { %p88_p4 = pnand %p87_p3, %p81_p0 }
   0xa   :  { %91 = shalt.err (!%p88_p4)
}
   0xb   :  { %s117_s9 = smov 32   ;;  %s118_s10 = smov 2  }
   0xc   :  { %19 = dma.hbm_to_vmem [thread:$0]  %s136_s0, 96, %s14_s7, [#allocation3], %s117_s9, %s117_s9, %s118_s10  }
   0xd   :  { %112 = dma.done.wait [#allocation3], 96  }
   0xe   :  { %113 = vsyncadd [#allocation3], 4294967200  ;;  %v23_v0 = vld [vmem:[#allocation2] sm:$0x3]  ;;  %v25_v1 = vld [vmem:[#allocation2 + $0x2] sm:$0x3]  ;;  %v44_v15 = vlaneseq }
   0xf   :  { %v27_v2 = vld [vmem:[#allocation2 + $0x4] sm:$0x3]  ;;  %v28_v3 = vmul.f32 0.2126, %v23_v0  ;;  %v29_v4 = vmul.f32 0.7152, %v25_v1 }
  0x10   :  { %v31_v5 = vmul.f32 0.0722, %v27_v2  ;;  %s119_s0 = smov [#allocation5]   ;;  %vm46_vm1 = vcmp.lt.s32.totalorder %v44_v15, 256 }
  0x11   :  { %v30_v6 = vadd.f32 %v29_v4, %v28_v3  ;;  %s55_s13 = sshll.u32 %s119_s0, 4  ;;  %s56_s13 = int_to_ptr.vmem [resolvable:$true] %s55_s13 }
  0x12   :  { %s92_s14 = scalar_lea.vmem %s56_s13, 32  ;;  %p97_p6 = scmp.lt.s32.totalorder %s56_s13, %s56_s13 }
  0x13   :  { %v32_v7 = vadd.f32 %v31_v5, %v30_v6  ;;  %p93_p5 = scmp.ne.s32.totalorder %s56_s13, %s92_s14  ;;  %p98_p7 = scmp.lt.s32.totalorder %s92_s14, %s92_s14 }
  0x15   :  { %v34_v8 = vadd.f32 0.055, %v32_v7  ;;  %v33_v16 = vmul.f32 0.07739938, %v32_v7  ;;  %vm42_vm0 = vcmp.le.f32.partialorder %v32_v7, 0.04045  ;;  %p99_p8 = por %p98_p7, %p97_p6 }
  0x17   :  { %v35_v9 = vmul.f32 0.9478673, %v34_v8  ;;  %p100_p9 = pnand %p99_p8, %p93_p5 }
  0x19   :  { %v36_v10 = vmax.f32 %v35_v9, 1e-12 }
  0x1b   :  { %68 = vlog2.f32 %v36_v10 }
  0x28   :  { %v69_v11 = vpop.eup %68 }
  0x29   :  { %v38_v12 = vmul.f32 0.6931472, %v69_v11 }
  0x2b   :  { %v39_v13 = vmul.f32 2.4, %v38_v12 }
  0x2d   :  { %v40_v14 = vmul.f32 1.442695, %v39_v13 }
  0x2f   :  { %70 = vpow2.f32 %v40_v14 }
  0x3c   :  { %v71_v17 = vpop.eup %70 }
  0x3d   :  { %v43_v18 = vsel %vm42_vm0, %v33_v16, %v71_v17 }
  0x3e   :  { %48 = vst.msk [vmem:[#allocation5] sm:$0x3] %vm46_vm1, %v43_v18 }
  0x3f   :  { %103 = shalt.err (!%p100_p9)
}
  0x40   :  { %58 = dma.vmem_to_hbm [thread:$0]  %s56_s13, 32, %s137_s1, [#allocation4]  }
  0x41   :  { %114 = dma.done.wait [#allocation4], 32  }
  0x42   :  { %115 = vsyncadd [#allocation4], 4294967264 }
  0x43   :  { %62 = vsyncpa [#allocation3], 1 }
  0x44   :  { %63 = vsyncpa [#allocation4], 1 }

</bundles_post_ra>
